<compile_context>
chip_gen: v7x
topology: tpu7x:2x2x1
jax: 0.10.0
libtpu: 0.0.40
codegen_flags: <defaults>
</compile_context>

<pallas_src>
import functools

import jax
import jax.numpy as jnp
from jax import lax
from jax.experimental import pallas as pl
from jax.experimental.pallas import tpu as pltpu

NAV_T = 1.0
BETA = 0.01            # unused in forward, kept for parity with __init__
S_PAR = 0.5
EPS = 1e-6
L2_EPS = 1e-12         # matches torch.nn.functional.normalize default eps
L2_EPS_SQ = L2_EPS * L2_EPS
_INV_NAV_T = 1.0 / NAV_T
# Finite stand-in for -inf so that an all-padding core split never produces
# (-inf) - (-inf) = nan; its garbage partial is zeroed by exp(m_c - m) = 0 in
# the wrapper merge.
NEG_BIG = -1e30
_N_SPLITS = 2          # leading "parallel" grid axis -> megacore split on v7x


def _proto_klprop_kernel(mu_ref, prop_ref, ft_ref,
                         src_out, m_out, l_out, numt_out,
                         inv_mu_scr, logp_scr, m_scr, l_scr, numt_scr, src_scr,
                         *, m_total, ragged):
    c = pl.program_id(0)          # core-split index (halves of M)
    j = pl.program_id(1)          # streamed f_t tile index within the half
    nj = pl.num_programs(1)

    @pl.when(j == 0)
    def _init():
        # Grid-invariant per-class work, hoisted out of the hot loop: computed
        # once per core split instead of once per tile.
        mu_f = mu_ref[...].astype(jnp.float32)
        inv_mu_scr[...] = lax.rsqrt(
            jnp.maximum(jnp.sum(mu_f * mu_f, axis=1, keepdims=True), L2_EPS_SQ))
        logp_scr[...] = jnp.log(prop_ref[...].astype(jnp.float32) + EPS)
        m_scr[...] = jnp.full_like(m_scr, NEG_BIG)
        l_scr[...] = jnp.zeros_like(l_scr)
        numt_scr[...] = jnp.zeros_like(numt_scr)
        src_scr[...] = jnp.zeros_like(src_scr)

    mu = mu_ref[...]                                   # (K, F) native dtype
    ft = ft_ref[...]                                   # (Mt, F)
    inv_mu = inv_mu_scr[...]                           # (K, 1)

    # --- single MXU matmul, contract F on both sides (no ft.T relayout) ------
    sim = lax.dot_general(mu, ft, (((1,), (1,)), ((), ())),
                          preferred_element_type=jnp.float32)        # (K, Mt)

    # ||f_t||^2 per row as a lane-dense (1, Mt) row via a tiny MXU matvec
    # (avoids a sublane->lane transpose of a (Mt, 1) column).
    ft_f = ft.astype(jnp.float32)
    ones_row = jnp.ones((1, ft_f.shape[1]), jnp.float32)
    ft_sq = lax.dot_general(ones_row, ft_f * ft_f, (((1,), (1,)), ((), ())),
                            preferred_element_type=jnp.float32)      # (1, Mt)
    # F.normalize semantics: 1/max(||x||, eps) == rsqrt(max(||x||^2, eps^2)).
    inv_ft = lax.rsqrt(jnp.maximum(ft_sq, L2_EPS_SQ))                # (1, Mt)
    # NOTE: zero-padded f_t rows give inv_ft = 1/L2_EPS = 1e12.  That is only
    # harmless because sim == 0 there AND the source column is masked and the
    # target weight p underflows to 0.  Keep this invariant on refactors.

    logits = sim if _INV_NAV_T == 1.0 else sim * _INV_NAV_T          # (K, Mt)
    K, Mt = logits.shape

    if ragged:
        # (1, Mt) lane-row mask; broadcasting covers K.
        col = lax.broadcasted_iota(jnp.int32, (1, Mt), 1) + (c * nj + j) * Mt
        valid = col < m_total

    # --- source part: softmax over classes (axis 0) is tile-local ------------
    new_logits = logits + logp_scr[...]                              # (K, Mt)
    s_max = jnp.max(new_logits, axis=0, keepdims=True)               # (1, Mt)
    s_exp = jnp.exp(new_logits - s_max)                              # (K, Mt)
    s_den = jnp.sum(s_exp, axis=0, keepdims=True)                    # (1, Mt)
    # sum_k(cost * s_dist) = 1 - inv_ft * sum_k(inv_mu*sim*s_exp) / s_den
    a_col = jnp.sum((inv_mu * sim) * s_exp, axis=0, keepdims=True)   # (1, Mt)
    src_col = 1.0 - (inv_ft * a_col) * pl.reciprocal(s_den, approx=True)
    if ragged:
        src_col = jnp.where(valid, src_col, 0.0)
    src_scr[...] += src_col

    # --- target part: softmax over samples (axis 1) spans tiles -> online ----
    logits_m = jnp.where(valid, logits, NEG_BIG) if ragged else logits
    tile_max = jnp.max(logits_m, axis=1, keepdims=True)              # (K, 1)
    m_new = jnp.maximum(m_scr[...], tile_max)
    alpha = jnp.exp(m_scr[...] - m_new)                              # (K, 1)
    p = jnp.exp(logits_m - m_new)                                    # (K, Mt)
    p_sum = jnp.sum(p, axis=1, keepdims=True)                        # (K, 1)
    # sum_m(cost * p) = p_sum - inv_mu * sum_m(inv_ft*sim*p)
    b_row = jnp.sum((inv_ft * sim) * p, axis=1, keepdims=True)       # (K, 1)
    l_scr[...] = alpha * l_scr[...] + p_sum
    numt_scr[...] = alpha * numt_scr[...] + (p_sum - inv_mu * b_row)
    m_scr[...] = m_new

    # --- per-core partial outputs, written once on the last tile -------------
    @pl.when(j == nj - 1)
    def _finalize():
        src_out[...] = jnp.sum(src_scr[...]).reshape(1, 1, 1)
        m_out[...] = m_scr[...].reshape(1, K, 1)
        l_out[...] = l_scr[...].reshape(1, K, 1)
        numt_out[...] = numt_scr[...].reshape(1, K, 1)


def _round_up(x, m):
    return ((x + m - 1) // m) * m


def proto_klprop_loss(mu_s, f_t, gt_prop, *, m_tile=2048):
    """mu_s: (K,F), f_t: (M,F), gt_prop: (K,1) -> scalar float32 loss."""
    K, F = mu_s.shape
    M, F2 = f_t.shape
    assert F == F2 and gt_prop.shape == (K, 1)
    assert M >= 1

    itemsize = jnp.dtype(f_t.dtype).itemsize
    # dtype-specific sublane multiple: 8 for 4B, 16 for 2B (bf16), 32 for 1B.
    sub = {4: 8, 2: 16, 1: 32}.get(itemsize, 8)

    # VMEM-budget-aware tile size.  Footprint ~= double-buffered f_t block +
    # ~8 live (K, Mt) f32 temporaries + small resident pieces; budget chosen so
    # it fits v7x's 64 MiB/TC VMEM (conservative but fine on v5e/v6e).
    per_mt = 2 * F * itemsize + 8 * K * 4 + 8
    fixed = 2 * K * F * jnp.dtype(mu_s.dtype).itemsize + 32 * K * 4 + (1 << 20)
    budget = 48 * 1024 * 1024
    mt_cap = max(sub, ((budget - fixed) // per_mt) // sub * sub)
    mt = min(_round_up(m_tile, sub),
             _round_up(-(-M // _N_SPLITS), sub),    # don't exceed a half of M
             int(mt_cap))

    m_pad = _round_up(M, _N_SPLITS * mt)
    nj = m_pad // (_N_SPLITS * mt)
    ragged = (m_pad != M)
    if ragged:
        f_t = jnp.pad(f_t, ((0, m_pad - M), (0, 0)))

    footprint = fixed + per_mt * mt
    vmem_limit = int(min(64 << 20, max(32 << 20, 2 * footprint)))

    kernel = functools.partial(_proto_klprop_kernel, m_total=M, ragged=ragged)

    out_shapes = (
        jax.ShapeDtypeStruct((_N_SPLITS, 1, 1), jnp.float32),   # source partials
        jax.ShapeDtypeStruct((_N_SPLITS, K, 1), jnp.float32),   # running max
        jax.ShapeDtypeStruct((_N_SPLITS, K, 1), jnp.float32),   # softmax denom
        jax.ShapeDtypeStruct((_N_SPLITS, K, 1), jnp.float32),   # cost*p numerator
    )

    src_p, m_p, l_p, numt_p = pl.pallas_call(
        kernel,
        out_shape=out_shapes,
        grid_spec=pltpu.PrefetchScalarGridSpec(
            num_scalar_prefetch=0,
            grid=(_N_SPLITS, nj),
            in_specs=[
                pl.BlockSpec((K, F), lambda c, j: (0, 0)),          # mu_s resident
                pl.BlockSpec((K, 1), lambda c, j: (0, 0)),          # gt_prop resident
                pl.BlockSpec((mt, F), lambda c, j: (c * nj + j, 0)),  # f_t streamed
            ],
            out_specs=[
                pl.BlockSpec((1, 1, 1), lambda c, j: (c, 0, 0)),
                pl.BlockSpec((1, K, 1), lambda c, j: (c, 0, 0)),
                pl.BlockSpec((1, K, 1), lambda c, j: (c, 0, 0)),
                pl.BlockSpec((1, K, 1), lambda c, j: (c, 0, 0)),
            ],
            scratch_shapes=[
                pltpu.VMEM((K, 1), jnp.float32),    # inv ||mu|| (hoisted)
                pltpu.VMEM((K, 1), jnp.float32),    # log(prop + eps) (hoisted)
                pltpu.VMEM((K, 1), jnp.float32),    # running row max
                pltpu.VMEM((K, 1), jnp.float32),    # running softmax denom
                pltpu.VMEM((K, 1), jnp.float32),    # running cost*exp numerator
                pltpu.VMEM((1, mt), jnp.float32),   # per-column source accum
            ],
        ),
        compiler_params=pltpu.CompilerParams(
            dimension_semantics=("parallel", "arbitrary"),
            vmem_limit_bytes=vmem_limit,
        ),
    )(mu_s, gt_prop, f_t)

    # --- tiny per-core merge in the wrapper (online-softmax combine) ---------
    prop = gt_prop.astype(jnp.float32)                       # (K, 1)
    source_loss = jnp.sum(src_p) * (S_PAR / M)
    m = jnp.max(m_p, axis=0)                                 # (K, 1)
    scale = jnp.exp(m_p - m)                                 # (_N_SPLITS, K, 1)
    l = jnp.sum(scale * l_p, axis=0)                         # (K, 1)
    numt = jnp.sum(scale * numt_p, axis=0)                   # (K, 1)
    target_loss = (1.0 - S_PAR) * jnp.sum((numt / l) * prop)
    return source_loss + target_loss


def _reference(mu_s, f_t, gt_prop):
    """Pure-JAX reference mirroring the PyTorch forward, for verification."""
    mu = mu_s.astype(jnp.float32)
    ft = f_t.astype(jnp.float32)
    prop = gt_prop.astype(jnp.float32)
    sim = mu @ ft.T
    new_logits = sim / NAV_T + jnp.log(prop + EPS)
    s_dist = jax.nn.softmax(new_logits, axis=0)
    t_dist = jax.nn.softmax(sim / NAV_T, axis=1)
    mu_n = mu / jnp.maximum(jnp.linalg.norm(mu, axis=1, keepdims=True), L2_EPS)
    ft_n = ft / jnp.maximum(jnp.linalg.norm(ft, axis=1, keepdims=True), L2_EPS)
    cost = 1.0 - mu_n @ ft_n.T
    source_loss = jnp.mean(jnp.sum(S_PAR * cost * s_dist, axis=0))
    target_loss = jnp.sum(
        jnp.sum((1.0 - S_PAR) * cost * t_dist, axis=1) * prop[:, 0])
    return source_loss + target_loss


def _check(loss, ref, tag):
    loss_f, ref_f = float(loss), float(ref)
    tol = 1e-3 + 2e-3 * abs(ref_f)   # approx-reciprocal path: ~2^-12 rel error
    if not bool(jnp.isfinite(loss)) or abs(loss_f - ref_f) > tol:
        raise AssertionError(f"{tag} mismatch: kernel={loss_f} ref={ref_f}")


if __name__ == "__main__":
    K, M, F = 8, 16, 128   # num_classes, num target samples, feature dim
    key = jax.random.PRNGKey(0)
    k1, k2, k3 = jax.random.split(key, 3)

    mu_s = jax.random.normal(k1, (K, F), dtype=jnp.float32)
    f_t = jax.random.normal(k2, (M, F), dtype=jnp.float32)
    gt_prop = jax.nn.softmax(jax.random.normal(k3, (K,), dtype=jnp.float32))
    gt_prop = gt_prop.reshape(K, 1)

    # Non-ragged path (no masking code compiled), one tile per core split.
    loss = jax.block_until_ready(proto_klprop_loss(mu_s, f_t, gt_prop))
    _check(loss, jax.block_until_ready(_reference(mu_s, f_t, gt_prop)), "base")

    # Ragged-M path (padding mask + online softmax), one tile per core split.
    M2 = 13
    f_t2 = jax.random.normal(k2, (M2, F), dtype=jnp.float32)
    loss2 = jax.block_until_ready(proto_klprop_loss(mu_s, f_t2, gt_prop))
    _check(loss2, jax.block_until_ready(_reference(mu_s, f_t2, gt_prop)),
           "ragged")

    # Multi-tile online-softmax path with a tiny forced tile (m_tile=8).
    M3 = 40
    f_t3 = jax.random.normal(k2, (M3, F), dtype=jnp.float32)
    loss3 = jax.block_until_ready(
        proto_klprop_loss(mu_s, f_t3, gt_prop, m_tile=8))
    _check(loss3, jax.block_until_ready(_reference(mu_s, f_t3, gt_prop)),
           "multi-tile")

    print("KERNEL_OK")
</pallas_src>

<mosaic_0001>
module attributes {stable_mosaic.version = 11 : i64} {
  func.func @_proto_klprop_kernel(%arg0: i32, %arg1: i32, %arg2: memref<8x128xf32, #tpu.memory_space<vmem>>, %arg3: memref<8x1xf32, #tpu.memory_space<vmem>>, %arg4: memref<8x128xf32, #tpu.memory_space<vmem>>, %arg5: memref<1x1x1xf32, #tpu.memory_space<vmem>>, %arg6: memref<1x8x1xf32, #tpu.memory_space<vmem>>, %arg7: memref<1x8x1xf32, #tpu.memory_space<vmem>>, %arg8: memref<1x8x1xf32, #tpu.memory_space<vmem>>, %arg9: memref<8x1xf32, #tpu.memory_space<vmem>>, %arg10: memref<8x1xf32, #tpu.memory_space<vmem>>, %arg11: memref<8x1xf32, #tpu.memory_space<vmem>>, %arg12: memref<8x1xf32, #tpu.memory_space<vmem>>, %arg13: memref<8x1xf32, #tpu.memory_space<vmem>>, %arg14: memref<1x8xf32, #tpu.memory_space<vmem>>) attributes {dimension_semantics = [#tpu.dimension_semantics<parallel>, #tpu.dimension_semantics<arbitrary>], iteration_bounds = array<i64: 2, 1>, scalar_prefetch = 0 : i64, scratch_operands = 6 : i64, tpu.core_type = #tpu.core_type<tc>, window_params = [{pipeline_mode = #tpu.pipeline_mode<synchronous>, transform_indices = @transform_0, window_bounds = array<i64: 8, 128>}, {pipeline_mode = #tpu.pipeline_mode<synchronous>, transform_indices = @transform_1, window_bounds = array<i64: 8, 1>}, {transform_indices = @transform_2, window_bounds = array<i64: 8, 128>}, {transform_indices = @transform_3, window_bounds = array<i64: 1, 1, 1>}, {transform_indices = @transform_4, window_bounds = array<i64: 1, 8, 1>}, {transform_indices = @transform_5, window_bounds = array<i64: 1, 8, 1>}, {transform_indices = @transform_6, window_bounds = array<i64: 1, 8, 1>}]} {
    %c0_i32 = arith.constant 0 : i32
    %0 = arith.cmpi eq, %arg1, %c0_i32 : i32
    %1 = arith.extui %0 : i1 to i32
    %c0_i32_0 = arith.constant 0 : i32
    %2 = arith.cmpi ne, %1, %c0_i32_0 : i32
    scf.if %2 {
      %c0_38 = arith.constant 0 : index
      %c0_39 = arith.constant 0 : index
      %67 = vector.load %arg2[%c0_38, %c0_39] : memref<8x128xf32, #tpu.memory_space<vmem>>, vector<8x128xf32>
      %68 = arith.mulf %67, %67 : vector<8x128xf32>
      %cst_40 = arith.constant dense<0.000000e+00> : vector<8xf32>
      %69 = vector.multi_reduction <add>, %68, %cst_40 [1] : vector<8x128xf32> to vector<8xf32>
      %70 = vector.shape_cast %69 : vector<8xf32> to vector<8x1xf32>
      %cst_41 = arith.constant 1.000000e-24 : f32
      %71 = vector.broadcast %cst_41 : f32 to vector<8x1xf32>
      %72 = arith.maximumf %70, %71 : vector<8x1xf32>
      %73 = math.rsqrt %72 : vector<8x1xf32>
      %c0_42 = arith.constant 0 : index
      %c0_43 = arith.constant 0 : index
      %74 = vector.load %arg9[%c0_42, %c0_43] : memref<8x1xf32, #tpu.memory_space<vmem>>, vector<8x1xf32>
      tpu.vector_store %arg9[%c0_42, %c0_43], %73 {strides = array<i32>} : memref<8x1xf32, #tpu.memory_space<vmem>>, vector<8x1xf32>,
      %c0_44 = arith.constant 0 : index
      %c0_45 = arith.constant 0 : index
      %75 = vector.load %arg3[%c0_44, %c0_45] : memref<8x1xf32, #tpu.memory_space<vmem>>, vector<8x1xf32>
      %cst_46 = arith.constant 9.99999997E-7 : f32
      %76 = vector.broadcast %cst_46 : f32 to vector<8x1xf32>
      %77 = arith.addf %75, %76 : vector<8x1xf32>
      %78 = math.log %77 : vector<8x1xf32>
      %c0_47 = arith.constant 0 : index
      %c0_48 = arith.constant 0 : index
      %79 = vector.load %arg10[%c0_47, %c0_48] : memref<8x1xf32, #tpu.memory_space<vmem>>, vector<8x1xf32>
      tpu.vector_store %arg10[%c0_47, %c0_48], %78 {strides = array<i32>} : memref<8x1xf32, #tpu.memory_space<vmem>>, vector<8x1xf32>,
      %cst_49 = arith.constant -1.000000e+30 : f32
      %80 = vector.broadcast %cst_49 : f32 to vector<8x1xf32>
      %c0_50 = arith.constant 0 : index
      %c0_51 = arith.constant 0 : index
      %81 = vector.load %arg11[%c0_50, %c0_51] : memref<8x1xf32, #tpu.memory_space<vmem>>, vector<8x1xf32>
      tpu.vector_store %arg11[%c0_50, %c0_51], %80 {strides = array<i32>} : memref<8x1xf32, #tpu.memory_space<vmem>>, vector<8x1xf32>,
      %cst_52 = arith.constant 0.000000e+00 : f32
      %82 = vector.broadcast %cst_52 : f32 to vector<8x1xf32>
      %c0_53 = arith.constant 0 : index
      %c0_54 = arith.constant 0 : index
      %83 = vector.load %arg12[%c0_53, %c0_54] : memref<8x1xf32, #tpu.memory_space<vmem>>, vector<8x1xf32>
      tpu.vector_store %arg12[%c0_53, %c0_54], %82 {strides = array<i32>} : memref<8x1xf32, #tpu.memory_space<vmem>>, vector<8x1xf32>,
      %cst_55 = arith.constant 0.000000e+00 : f32
      %84 = vector.broadcast %cst_55 : f32 to vector<8x1xf32>
      %c0_56 = arith.constant 0 : index
      %c0_57 = arith.constant 0 : index
      %85 = vector.load %arg13[%c0_56, %c0_57] : memref<8x1xf32, #tpu.memory_space<vmem>>, vector<8x1xf32>
      tpu.vector_store %arg13[%c0_56, %c0_57], %84 {strides = array<i32>} : memref<8x1xf32, #tpu.memory_space<vmem>>, vector<8x1xf32>,
      %cst_58 = arith.constant 0.000000e+00 : f32
      %86 = vector.broadcast %cst_58 : f32 to vector<1x8xf32>
      %c0_59 = arith.constant 0 : index
      %c0_60 = arith.constant 0 : index
      %87 = vector.load %arg14[%c0_59, %c0_60] : memref<1x8xf32, #tpu.memory_space<vmem>>, vector<1x8xf32>
      tpu.vector_store %arg14[%c0_59, %c0_60], %86 {strides = array<i32>} : memref<1x8xf32, #tpu.memory_space<vmem>>, vector<1x8xf32>,
    } else {
    }
    %c0 = arith.constant 0 : index
    %c0_1 = arith.constant 0 : index
    %3 = vector.load %arg2[%c0, %c0_1] : memref<8x128xf32, #tpu.memory_space<vmem>>, vector<8x128xf32>
    %c0_2 = arith.constant 0 : index
    %c0_3 = arith.constant 0 : index
    %4 = vector.load %arg4[%c0_2, %c0_3] : memref<8x128xf32, #tpu.memory_space<vmem>>, vector<8x128xf32>
    %c0_4 = arith.constant 0 : index
    %c0_5 = arith.constant 0 : index
    %5 = vector.load %arg9[%c0_4, %c0_5] : memref<8x1xf32, #tpu.memory_space<vmem>>, vector<8x1xf32>
    %cst = arith.constant dense<0.000000e+00> : vector<8x8xf32>
    %6 = tpu.matmul %3, %4, %cst {dimension_numbers = #tpu.dot_dimension_numbers<[1], [1], [0], [0], [0, 0, 1, 0], [], []>} : vector<8x128xf32>, vector<8x128xf32>, vector<8x8xf32> -> vector<8x8xf32>
    %cst_6 = arith.constant 1.000000e+00 : f32
    %7 = vector.broadcast %cst_6 : f32 to vector<1x128xf32>
    %8 = arith.mulf %4, %4 : vector<8x128xf32>
    %cst_7 = arith.constant dense<0.000000e+00> : vector<1x8xf32>
    %9 = tpu.matmul %7, %8, %cst_7 {dimension_numbers = #tpu.dot_dimension_numbers<[1], [1], [0], [0], [0, 0, 1, 0], [], []>} : vector<1x128xf32>, vector<8x128xf32>, vector<1x8xf32> -> vector<1x8xf32>
    %cst_8 = arith.constant 1.000000e-24 : f32
    %10 = vector.broadcast %cst_8 : f32 to vector<1x8xf32>
    %11 = arith.maximumf %9, %10 : vector<1x8xf32>
    %12 = math.rsqrt %11 : vector<1x8xf32>
    %c0_9 = arith.constant 0 : index
    %c0_10 = arith.constant 0 : index
    %13 = vector.load %arg10[%c0_9, %c0_10] : memref<8x1xf32, #tpu.memory_space<vmem>>, vector<8x1xf32>
    %14 = vector.broadcast %13 : vector<8x1xf32> to vector<8x8xf32>
    %15 = arith.addf %6, %14 : vector<8x8xf32>
    %cst_11 = arith.constant dense<0xFF800000> : vector<8xf32>
    %16 = vector.multi_reduction <maximumf>, %15, %cst_11 [0] : vector<8x8xf32> to vector<8xf32>
    %17 = vector.shape_cast %16 : vector<8xf32> to vector<1x8xf32>
    %18 = vector.broadcast %17 : vector<1x8xf32> to vector<8x8xf32>
    %19 = arith.subf %15, %18 : vector<8x8xf32>
    %20 = math.exp %19 : vector<8x8xf32>
    %cst_12 = arith.constant dense<0.000000e+00> : vector<8xf32>
    %21 = vector.multi_reduction <add>, %20, %cst_12 [0] : vector<8x8xf32> to vector<8xf32>
    %22 = vector.shape_cast %21 : vector<8xf32> to vector<1x8xf32>
    %23 = vector.broadcast %5 : vector<8x1xf32> to vector<8x8xf32>
    %24 = arith.mulf %23, %6 : vector<8x8xf32>
    %25 = arith.mulf %24, %20 : vector<8x8xf32>
    %cst_13 = arith.constant dense<0.000000e+00> : vector<8xf32>
    %26 = vector.multi_reduction <add>, %25, %cst_13 [0] : vector<8x8xf32> to vector<8xf32>
    %27 = vector.shape_cast %26 : vector<8xf32> to vector<1x8xf32>
    %28 = arith.mulf %12, %27 : vector<1x8xf32>
    %29 = tpu.reciprocal %22 {approx = true} : vector<1x8xf32> -> vector<1x8xf32>
    %30 = arith.mulf %28, %29 : vector<1x8xf32>
    %cst_14 = arith.constant 1.000000e+00 : f32
    %31 = vector.broadcast %cst_14 : f32 to vector<1x8xf32>
    %32 = arith.subf %31, %30 : vector<1x8xf32>
    %c0_15 = arith.constant 0 : index
    %c0_16 = arith.constant 0 : index
    %33 = vector.load %arg14[%c0_15, %c0_16] : memref<1x8xf32, #tpu.memory_space<vmem>>, vector<1x8xf32>
    %34 = arith.addf %33, %32 : vector<1x8xf32>
    %c0_17 = arith.constant 0 : index
    %c0_18 = arith.constant 0 : index
    %35 = vector.load %arg14[%c0_17, %c0_18] : memref<1x8xf32, #tpu.memory_space<vmem>>, vector<1x8xf32>
    tpu.vector_store %arg14[%c0_17, %c0_18], %34 {strides = array<i32>} : memref<1x8xf32, #tpu.memory_space<vmem>>, vector<1x8xf32>,
    %cst_19 = arith.constant dense<0xFF800000> : vector<8xf32>
    %36 = vector.multi_reduction <maximumf>, %6, %cst_19 [1] : vector<8x8xf32> to vector<8xf32>
    %37 = vector.shape_cast %36 : vector<8xf32> to vector<8x1xf32>
    %c0_20 = arith.constant 0 : index
    %c0_21 = arith.constant 0 : index
    %38 = vector.load %arg11[%c0_20, %c0_21] : memref<8x1xf32, #tpu.memory_space<vmem>>, vector<8x1xf32>
    %39 = arith.maximumf %38, %37 : vector<8x1xf32>
    %c0_22 = arith.constant 0 : index
    %c0_23 = arith.constant 0 : index
    %40 = vector.load %arg11[%c0_22, %c0_23] : memref<8x1xf32, #tpu.memory_space<vmem>>, vector<8x1xf32>
    %41 = arith.subf %40, %39 : vector<8x1xf32>
    %42 = math.exp %41 : vector<8x1xf32>
    %43 = vector.broadcast %39 : vector<8x1xf32> to vector<8x8xf32>
    %44 = arith.subf %6, %43 : vector<8x8xf32>
    %45 = math.exp %44 : vector<8x8xf32>
    %cst_24 = arith.constant dense<0.000000e+00> : vector<8xf32>
    %46 = vector.multi_reduction <add>, %45, %cst_24 [1] : vector<8x8xf32> to vector<8xf32>
    %47 = vector.shape_cast %46 : vector<8xf32> to vector<8x1xf32>
    %48 = vector.broadcast %12 : vector<1x8xf32> to vector<8x8xf32>
    %49 = arith.mulf %48, %6 : vector<8x8xf32>
    %50 = arith.mulf %49, %45 : vector<8x8xf32>
    %cst_25 = arith.constant dense<0.000000e+00> : vector<8xf32>
    %51 = vector.multi_reduction <add>, %50, %cst_25 [1] : vector<8x8xf32> to vector<8xf32>
    %52 = vector.shape_cast %51 : vector<8xf32> to vector<8x1xf32>
    %c0_26 = arith.constant 0 : index
    %c0_27 = arith.constant 0 : index
    %53 = vector.load %arg12[%c0_26, %c0_27] : memref<8x1xf32, #tpu.memory_space<vmem>>, vector<8x1xf32>
    %54 = arith.mulf %42, %53 : vector<8x1xf32>
    %55 = arith.addf %54, %47 : vector<8x1xf32>
    %c0_28 = arith.constant 0 : index
    %c0_29 = arith.constant 0 : index
    %56 = vector.load %arg12[%c0_28, %c0_29] : memref<8x1xf32, #tpu.memory_space<vmem>>, vector<8x1xf32>
    tpu.vector_store %arg12[%c0_28, %c0_29], %55 {strides = array<i32>} : memref<8x1xf32, #tpu.memory_space<vmem>>, vector<8x1xf32>,
    %c0_30 = arith.constant 0 : index
    %c0_31 = arith.constant 0 : index
    %57 = vector.load %arg13[%c0_30, %c0_31] : memref<8x1xf32, #tpu.memory_space<vmem>>, vector<8x1xf32>
    %58 = arith.mulf %42, %57 : vector<8x1xf32>
    %59 = arith.mulf %5, %52 : vector<8x1xf32>
    %60 = arith.subf %47, %59 : vector<8x1xf32>
    %61 = arith.addf %58, %60 : vector<8x1xf32>
    %c0_32 = arith.constant 0 : index
    %c0_33 = arith.constant 0 : index
    %62 = vector.load %arg13[%c0_32, %c0_33] : memref<8x1xf32, #tpu.memory_space<vmem>>, vector<8x1xf32>
    tpu.vector_store %arg13[%c0_32, %c0_33], %61 {strides = array<i32>} : memref<8x1xf32, #tpu.memory_space<vmem>>, vector<8x1xf32>,
    %c0_34 = arith.constant 0 : index
    %c0_35 = arith.constant 0 : index
    %63 = vector.load %arg11[%c0_34, %c0_35] : memref<8x1xf32, #tpu.memory_space<vmem>>, vector<8x1xf32>
    tpu.vector_store %arg11[%c0_34, %c0_35], %39 {strides = array<i32>} : memref<8x1xf32, #tpu.memory_space<vmem>>, vector<8x1xf32>,
    %c0_i32_36 = arith.constant 0 : i32
    %64 = arith.cmpi eq, %arg1, %c0_i32_36 : i32
    %65 = arith.extui %64 : i1 to i32
    %c0_i32_37 = arith.constant 0 : i32
    %66 = arith.cmpi ne, %65, %c0_i32_37 : i32
    scf.if %66 {
      %c0_38 = arith.constant 0 : index
      %c0_39 = arith.constant 0 : index
      %67 = vector.load %arg14[%c0_38, %c0_39] : memref<1x8xf32, #tpu.memory_space<vmem>>, vector<1x8xf32>
      %68 = vector.shape_cast %67 : vector<1x8xf32> to vector<1x1x8xf32>
      %cst_40 = arith.constant dense<0.000000e+00> : vector<1xf32>
      %69 = vector.multi_reduction <add>, %68, %cst_40 [1, 2] : vector<1x1x8xf32> to vector<1xf32>
      %70 = vector.shape_cast %69 : vector<1xf32> to vector<1x1x1xf32>
      %71 = vector.extract %70[0, 0, 0] : f32 from vector<1x1x1xf32>
      %72 = vector.broadcast %71 : f32 to vector<1x1x1xf32>
      %c0_41 = arith.constant 0 : index
      %c0_42 = arith.constant 0 : index
      %c0_43 = arith.constant 0 : index
      %73 = vector.load %arg5[%c0_41, %c0_42, %c0_43] : memref<1x1x1xf32, #tpu.memory_space<vmem>>, vector<1x1x1xf32>
      tpu.vector_store %arg5[%c0_41, %c0_42, %c0_43], %72 {strides = array<i32>} : memref<1x1x1xf32, #tpu.memory_space<vmem>>, vector<1x1x1xf32>,
      %c0_44 = arith.constant 0 : index
      %c0_45 = arith.constant 0 : index
      %74 = vector.load %arg11[%c0_44, %c0_45] : memref<8x1xf32, #tpu.memory_space<vmem>>, vector<8x1xf32>
      %75 = vector.shape_cast %74 : vector<8x1xf32> to vector<1x8x1xf32>
      %c0_46 = arith.constant 0 : index
      %c0_47 = arith.constant 0 : index
      %c0_48 = arith.constant 0 : index
      %76 = vector.load %arg6[%c0_46, %c0_47, %c0_48] : memref<1x8x1xf32, #tpu.memory_space<vmem>>, vector<1x8x1xf32>
      tpu.vector_store %arg6[%c0_46, %c0_47, %c0_48], %75 {strides = array<i32>} : memref<1x8x1xf32, #tpu.memory_space<vmem>>, vector<1x8x1xf32>,
      %c0_49 = arith.constant 0 : index
      %c0_50 = arith.constant 0 : index
      %77 = vector.load %arg12[%c0_49, %c0_50] : memref<8x1xf32, #tpu.memory_space<vmem>>, vector<8x1xf32>
      %78 = vector.shape_cast %77 : vector<8x1xf32> to vector<1x8x1xf32>
      %c0_51 = arith.constant 0 : index
      %c0_52 = arith.constant 0 : index
      %c0_53 = arith.constant 0 : index
      %79 = vector.load %arg7[%c0_51, %c0_52, %c0_53] : memref<1x8x1xf32, #tpu.memory_space<vmem>>, vector<1x8x1xf32>
      tpu.vector_store %arg7[%c0_51, %c0_52, %c0_53], %78 {strides = array<i32>} : memref<1x8x1xf32, #tpu.memory_space<vmem>>, vector<1x8x1xf32>,
      %c0_54 = arith.constant 0 : index
      %c0_55 = arith.constant 0 : index
      %80 = vector.load %arg13[%c0_54, %c0_55] : memref<8x1xf32, #tpu.memory_space<vmem>>, vector<8x1xf32>
      %81 = vector.shape_cast %80 : vector<8x1xf32> to vector<1x8x1xf32>
      %c0_56 = arith.constant 0 : index
      %c0_57 = arith.constant 0 : index
      %c0_58 = arith.constant 0 : index
      %82 = vector.load %arg8[%c0_56, %c0_57, %c0_58] : memref<1x8x1xf32, #tpu.memory_space<vmem>>, vector<1x8x1xf32>
      tpu.vector_store %arg8[%c0_56, %c0_57, %c0_58], %81 {strides = array<i32>} : memref<1x8x1xf32, #tpu.memory_space<vmem>>, vector<1x8x1xf32>,
    } else {
    }
    return
  }
  func.func @transform_0(%arg0: i32, %arg1: i32) -> (i32, i32) {
    %c0_i32 = arith.constant 0 : i32
    %c0_i32_0 = arith.constant 0 : i32
    %c0_i32_1 = arith.constant 0 : i32
    return %c0_i32, %c0_i32_0 : i32, i32
  }
  func.func @transform_1(%arg0: i32, %arg1: i32) -> (i32, i32) {
    %c0_i32 = arith.constant 0 : i32
    %c0_i32_0 = arith.constant 0 : i32
    %c0_i32_1 = arith.constant 0 : i32
    return %c0_i32, %c0_i32_0 : i32, i32
  }
  func.func @transform_2(%arg0: i32, %arg1: i32) -> (i32, i32) {
    %c1_i32 = arith.constant 1 : i32
    %0 = arith.muli %arg0, %c1_i32 : i32
    %1 = arith.addi %0, %arg1 : i32
    %c0_i32 = arith.constant 0 : i32
    %c0_i32_0 = arith.constant 0 : i32
    return %1, %c0_i32 : i32, i32
  }
  func.func @transform_3(%arg0: i32, %arg1: i32) -> (i32, i32, i32) {
    %c0_i32 = arith.constant 0 : i32
    %c0_i32_0 = arith.constant 0 : i32
    %c0_i32_1 = arith.constant 0 : i32
    return %arg0, %c0_i32, %c0_i32_0 : i32, i32, i32
  }
  func.func @transform_4(%arg0: i32, %arg1: i32) -> (i32, i32, i32) {
    %c0_i32 = arith.constant 0 : i32
    %c0_i32_0 = arith.constant 0 : i32
    %c0_i32_1 = arith.constant 0 : i32
    return %arg0, %c0_i32, %c0_i32_0 : i32, i32, i32
  }
  func.func @transform_5(%arg0: i32, %arg1: i32) -> (i32, i32, i32) {
    %c0_i32 = arith.constant 0 : i32
    %c0_i32_0 = arith.constant 0 : i32
    %c0_i32_1 = arith.constant 0 : i32
    return %arg0, %c0_i32, %c0_i32_0 : i32, i32, i32
  }
  func.func @transform_6(%arg0: i32, %arg1: i32) -> (i32, i32, i32) {
    %c0_i32 = arith.constant 0 : i32
    %c0_i32_0 = arith.constant 0 : i32
    %c0_i32_1 = arith.constant 0 : i32
    return %arg0, %c0_i32, %c0_i32_0 : i32, i32, i32
  }
}

</mosaic_0001>

<bundles_post_ra>
// kernel: tpu_custom_call.1
= control target key start
LH: loop header
LB: loop body
LE: loop exit
PB: predicated region body
PF: predicated region fallthrough
CT: control target
= control target key end

     0   :  { %12 = vsyncpa [#allocation9], 0  ;;  %s929_s21 = smov 0   ;;  %s931_s22 = smov 0   ;;  %s1062_s0 = inlined_call_operand.hbm [shape: f32[8,128], index: 0, kind: input, shape index: {}]   ;;  %s1063_s1 = inlined_call_operand.vmem [shape: f32[8,1], index: 1, kind: input, shape index: {}]   ;;  %s1064_s2 = inlined_call_operand.vmem [shape: f32[16,128], index: 2, kind: input, shape index: {}]   ;;  %s1065_s3 = inlined_call_operand.vmem [shape: f32[2,1,1], index: 3, kind: output, shape index: {0}]   ;;  %s1066_s4 = inlined_call_operand.vmem [shape: f32[2,8,1], index: 4, kind: output, shape index: {1}]   ;;  %s1067_s5 = inlined_call_operand.vmem [shape: f32[2,8,1], index: 5, kind: output, shape index: {2}]   ;;  %s1068_s6 = inlined_call_operand.vmem [shape: f32[2,8,1], index: 6, kind: output, shape index: {3}]  }
   0x1   :  { %s933_s23 = smov 0  }
   0x2 LB: > { %s747_s24 = sadd.s32 4294967295, %s886_s23   ;;  %s30_s25 = sadd.s32 1, %s882_s22  ;;  %s886_s23 = sphi %s933_s23, %s18_s23   ;;  %s882_s22 = sphi %s931_s22, %s1078_s22   ;;  %s878_s21 = sphi %s929_s21, %s1077_s21  }
   0x3   : > { %p32_p0 = scmp.ge.s32.totalorder %s30_s25, 2  ;;  %p749_p1 = scmp.ge.s32.totalorder %s886_s23, 1 }
   0x4   : > { %p209_p2 = scmp.lt.s32.totalorder %s886_s23, 3  ;;  %p954_p4 = scmp.eq.s32.totalorder %s747_s24, 0 }
   0x5   : > { %s1080_s25 = smov (%p32_p0, %s30_s25), 0  ;;  %s888_s28 = smov [#allocation8]  }
   0x6   : > { %p950_p3 = pnand %p749_p1, %p209_p2  ;;  %s222_s29 = sshll.u32 %s888_s28, 4  ;;  %s223_s29 = int_to_ptr.vmem [resolvable:$true] %s222_s29 }
   0x7   : > { %s1073_s27 = scalar_select %p954_p4, 1, 0 }
   0x8   : > { %s1072_s26 = scalar_select %p950_p3, 1, 0 }
   0x9   : > { %p780_p5 = pneg %p950_p3  ;;  %s832_s9 = scalar_lea.hbm %s1062_s0, 128 }
   0xa   : > { %p833_p7 = scmp.ne.s32.totalorder %s1062_s0, %s832_s9  ;;  %p839_p11 = scmp.lt.u32.totalorder %s832_s9, %s1062_s0 }
   0xb   : > { %p962_p6 = pnand %p954_p4, %p780_p5 }
   0xd   : > { %p834_p8 = pneg %p962_p6 }
   0xf   : > { %p835_p9 = pnand %p834_p8, %p833_p7 }
  0x11   : > { %p836_p10 = pneg %p835_p9 }
  0x13   : > { %p841_p12 = pnand %p839_p11, %p836_p10 }
  0x15   : > { %844 = shalt.err (!%p841_p12)
}
  0x16   : > { %s845_s14 = scalar_lea.vmem %s223_s29, 128  ;;  %p853_p2 = scmp.lt.s32.totalorder %s223_s29, %s223_s29 }
  0x17   : > { %p846_p13 = scmp.ne.s32.totalorder %s223_s29, %s845_s14  ;;  %p854_p5 = scmp.lt.s32.totalorder %s845_s14, %s845_s14 }
  0x19   : > { %p848_p0 = pnand %p846_p13, %p834_p8  ;;  %p855_p4 = por %p854_p5, %p853_p2 }
  0x1b   : > { %p849_p1 = pneg %p848_p0 }
  0x1d   : > { %p856_p3 = pnand %p855_p4, %p849_p1 }
  0x1f   : > { %859 = shalt.err (!%p856_p3)
}
  0x20   : > { %783 = dma.hbm_to_vmem [thread:$0]  (!%p962_p6), %s1062_s0, 128, %s223_s29, [#allocation9]  }
  0x21   : > { %p1075_p7 = scmp.ne.s32.totalorder %s1072_s26, 0 }
  0x22   : > { %p1076_p9 = scmp.ne.s32.totalorder (!%p1075_p7), %s1073_s27, 0 }
  0x23   : > { %247 = sbr.rel (%p1075_p7) target bundleno = 712 (0x2c8), region = 32 }
  0x2a   : > { %873 = dma.done.wait (%p1076_p9), [#allocation9], 128  }
  0x2b   : > { %875 = vsyncadd (%p1076_p9), [#allocation9], 4294967168  ;;  %p288_p8 = scmp.lt.s32.totalorder %s878_s21, 1  ;;  %v889_v0 = vmov 0.0   ;;  %vm318_vm0 = vcmask 7168   ;;  %vm890_vm1 = vmmov 0  }
  0x2c   : > { %764 = vmatprep.subr.mxu0 %v889_v0  ;;  %769 = vmatprep.subr.mxu1 %v889_v0  ;;  %326 = vst.msk [vmem:[#allocation5] sm:$0xff] %vm318_vm0, %v889_v0  ;;  %327 = vst.msk [vmem:[#allocation6] sm:$0xff] %vm318_vm0, %v889_v0  ;;  %v891_v1 = vmov 0   ;;  %v330_v3 = vld [vmem:[#allocation8] sm:$0xff]  ;;  %v320_v4 = vld [vmem:[%s1063_s1] sm:$0xff]  ;;  %v892_v8 = vmov 1.0  }
  0x2d   : > { %s1082_s21 = smov (!%p288_p8, %s878_s21), 1  ;;  %766 = vmatprep.mubr.msk.f32.mxu0 %vm890_vm1, %v889_v0  ;;  %771 = vmatprep.mubr.msk.f32.mxu1 %vm890_vm1, %v889_v0  ;;  %v313_v6 = vmul.f32 %v330_v3, %v330_v3  ;;  %v321_v7 = vadd.f32 1e-06, %v320_v4  ;;  %v893_v12 = vmov -1e+30   ;;  %vm483_vm2 = vcmask 64512  }
  0x2e   : > { %816 = vset.pattern.permute.xlu0 %v891_v1  ;;  %817 = vset.pattern.permute.xlu1 %v891_v1  ;;  %s995_s17 = sshll.u32 %s1082_s21, 3  ;;  %325 = vst.msk [vmem:[#allocation4] sm:$0xff] %vm318_vm0, %v893_v12  ;;  %vm328_vm3 = vcmask 57344   ;;  %s295_s8 = scalar_lea.vmem %s1065_s3, %s1082_s21  ;;  %vm578_vm4 = vcmask 0  }
  0x2f   : > { %s291_s20 = scalar_lea.vmem %s1064_s2, %s995_s17  ;;  %314 = vadd.xlane.f32.xlu0 %v313_v6  ;;  %818 = vlog2.f32 %v321_v7  ;;  %329 = vst.msk [vmem:[#allocation7] sm:$0x1] %vm328_vm3, %v889_v0  ;;  %s299_s29 = scalar_lea.vmem %s1066_s4, %s995_s17 }
  0x30   : > { %v331_v2 = vld [vmem:[%s291_s20] sm:$0xff]  ;;  %s303_s11 = scalar_lea.vmem %s1067_s5, %s995_s17  ;;  %s307_s14 = scalar_lea.vmem %s1068_s6, %s995_s17 }
  0x31   : > { %765 = vmatpush3.xpose.msra.mxu0 %v331_v2  ;;  %v403_v5 = vmul.f32 %v331_v2, %v331_v2  ;;  %v542_v2 = vlaneseq }
  0x33   : > { %770 = vmatpush3.xpose.msra.mxu1 %v403_v5  ;;  %v543_v5 = vshrl.u32 %v542_v2, 7 }
  0x34   : > { %767 = vmatmul.mubr.f32.vlgmr.msra.gmra.mrb[0].mxu0 %v330_v3 }
  0x35   : > { %v1018_v38 = vld [vmem:[#allocation4] sm:$0xff]  ;;  %v544_v7 = vsub.s32 0, %v543_v5 }
  0x36   : > { %772 = vmatmul.mubr.f32.vlgmr.msra.gmra.mrb[0].mxu1 %v892_v8  ;;  %v519_v61 = vld [vmem:[#allocation7] sm:$0x1] }
  0x39   : > { %v819_v9 = vpop.eup %818 }
  0x3a   : > { %v323_v10 = vmul.f32 0.6931472, %v819_v9 }
  0x3c   : > { %324 = vst.msk [vmem:[#allocation3] sm:$0xff] %vm318_vm0, %v323_v10 }
  0x43   : > { %v476_v11 = vld [vmem:[#allocation3] sm:$0xff] }
  0x45   : > { %479 = vperm.xlu0 %816, %v476_v11  }
  0xbc   : > { %v315_v13 = vpop.xlane.xlu0 %314 }
  0xbd   : > { %v316_v14 = vmax.f32 %v315_v13, 1e-24 }
  0xbf   : > { %820 = vrsqrt.f32 %v316_v14 }
  0xc4   : > { %v480_v22 = vpop.permute.xlu0 %479 }
  0xc9   : > { %v821_v15 = vpop.eup %820 }
  0xca   : > { %319 = vst.msk [vmem:[#allocation2] sm:$0xff] %vm318_vm0, %v821_v15 }
  0xd1   : > { %v1011_v21 = vld [vmem:[#allocation2] sm:$0xff] }
 0x107   : > { %v1007_v16 = vpop.f32.mrb[0].mxu0 }
 0x108   : > { %v768_v17 = vpop.f32.mrb[1].mxu0  ;;  %v523_v18 = vsel %vm483_vm2, %v1007_v16, -inf  ;;  %v482_v23 = vadd.f32 %v480_v22, %v1007_v16 }
 0x109   : > { %v470_v19 = vpop.f32.mrb[0].mxu1  ;;  %524 = vmax.xlane.f32.xlu1 %v523_v18 }
 0x10a   : > { %v773_v20 = vpop.f32.mrb[1].mxu1  ;;  %v484_v24 = vsel %vm483_vm2, %v482_v23, -inf  ;;  %v474_v46 = vmax.f32 %v470_v19, 1e-24 }
 0x10b   : > { %v485_v25 = vrot.slane %v484_v24, 4 }
 0x10d   : > { %v486_v26 = vmax.f32 %v484_v24, %v485_v25  ;;  %v551_v25 = vld [vmem:[#allocation5] sm:$0xff] }
 0x10f   : > { %v487_v27 = vrot.slane %v486_v26, 2 }
 0x111   : > { %v488_v28 = vmax.f32 %v486_v26, %v487_v27 }
 0x113   : > { %v489_v29 = vrot.slane %v488_v28, 1 }
 0x115   : > { %v490_v30 = vmax.f32 %v488_v28, %v489_v29  ;;  %v556_v29 = vld [vmem:[#allocation6] sm:$0xff] }
 0x117   : > { %v491_v31 = vsub.f32 %v482_v23, %v490_v30 }
 0x119   : > { %v492_v32 = vmul.f32 1.442695, %v491_v31 }
 0x11a   : > { %503 = vperm.xlu1 %817, %v1011_v21  }
 0x11b   : > { %822 = vpow2.f32 %v492_v32 }
 0x11c   : > { %824 = vrsqrt.f32 %v474_v46 }
 0x125   : > { %v823_v33 = vpop.eup %822 }
 0x126   : > { %v494_v34 = vsel %vm483_vm2, %v823_v33, 0.0  ;;  %v825_v57 = vpop.eup %824 }
 0x127   : > { %v495_v35 = vrot.slane %v494_v34, 4  ;;  %v545_v8 = vrot.slane %v825_v57, %v544_v7 }
 0x129   : > { %v496_v36 = vadd.f32 %v495_v35, %v494_v34  ;;  %v546_v9 = vmul.f32 %v545_v8, %v1007_v16 }
 0x12b   : > { %v497_v37 = vrot.slane %v496_v36, 2 }
 0x12d   : > { %v498_v40 = vadd.f32 %v497_v37, %v496_v36 }
 0x12f   : > { %v499_v44 = vrot.slane %v498_v40, 1 }
 0x131   : > { %v500_v48 = vadd.f32 %v499_v44, %v498_v40 }
 0x133   : > { %826 = vrcp.f32 %v500_v48 }
 0x13d   : > { %v827_v59 = vpop.eup %826 }
 0x196   : > { %v525_v39 = vpop.xlane.xlu1 %524 }
 0x197   : > { %v527_v41 = vmax.f32 %v1018_v38, %v525_v39 }
 0x199   : > { %v528_v42 = vsub.f32 %v1018_v38, %v527_v41  ;;  %562 = vst.msk [vmem:[#allocation4] sm:$0xff] %vm318_vm0, %v527_v41  ;;  %533 = vperm.xlu1 %817, %v527_v41  }
 0x19a   : > { %v504_v43 = vpop.permute.xlu1 %503 }
 0x19b   : > { %v506_v45 = vmul.f32 %v504_v43, %v1007_v16  ;;  %v529_v23 = vmul.f32 1.442695, %v528_v42 }
 0x19d   : > { %v507_v47 = vmul.f32 %v823_v33, %v506_v45 }
 0x19f   : > { %v508_v49 = vsel %vm483_vm2, %v507_v47, 0.0 }
 0x1a0   : > { %v580_v50 = vld [vmem:[#allocation4] sm:$0xff]  ;;  %v509_v51 = vrot.slane %v508_v49, 4 }
 0x1a1   : > { %581 = vst.msk [vmem:[%s299_s29] sm:$0xff] %vm318_vm0, %v580_v50 }
 0x1a2   : > { %v510_v52 = vadd.f32 %v509_v51, %v508_v49 }
 0x1a4   : > { %v511_v53 = vrot.slane %v510_v52, 2 }
 0x1a6   : > { %v512_v54 = vadd.f32 %v511_v53, %v510_v52 }
 0x1a8   : > { %v513_v55 = vrot.slane %v512_v54, 1 }
 0x1aa   : > { %v514_v56 = vadd.f32 %v513_v55, %v512_v54 }
 0x1ac   : > { %v515_v58 = vmul.f32 %v825_v57, %v514_v56 }
 0x1ae   : > { %v517_v60 = vmul.f32 %v827_v59, %v515_v58 }
 0x1b0   : > { %v518_v62 = vsub.f32 1.0, %v517_v60 }
 0x1b2   : > { %v520_v63 = vadd.f32 %v519_v61, %v518_v62 }
 0x1b4   : > { %522 = vst.msk [vmem:[#allocation7] sm:$0x1] %vm328_vm3, %v520_v63 }
 0x1bb   : > { %v566_v0 = vld [vmem:[#allocation7] sm:$0x1] }
 0x1bc   : > { %v567_v1 = vsel %vm328_vm3, %v566_v0, 0.0 }
 0x1bd   : > { %568 = vadd.xlane.f32.xlu1 %v567_v1 }
 0x218   : > { %v534_v3 = vpop.permute.xlu1 %533 }
 0x219   : > { %v536_v4 = vsub.f32 %v1007_v16, %v534_v3 }
 0x21b   : > { %v537_v6 = vmul.f32 1.442695, %v536_v4 }
 0x21d   : > { %828 = vpow2.f32 %v537_v6 }
 0x21e   : > { %830 = vpow2.f32 %v529_v23 }
 0x227   : > { %v829_v10 = vpop.eup %828 }
 0x228   : > { %v539_v11 = vsel %vm483_vm2, %v829_v10, 0.0  ;;  %v547_v12 = vmul.f32 %v829_v10, %v546_v9  ;;  %v831_v24 = vpop.eup %830 }
 0x229   : > { %540 = vadd.xlane.f32.xlu1 %v539_v11  ;;  %v552_v26 = vmul.f32 %v831_v24, %v551_v25  ;;  %v557_v32 = vmul.f32 %v831_v24, %v556_v29 }
 0x22a   : > { %v548_v13 = vsel %vm483_vm2, %v547_v12, 0.0 }
 0x22b   : > { %549 = vadd.xlane.f32.xlu0 %v548_v13 }
 0x24a   : > { %v569_v14 = vpop.xlane.xlu1 %568 }
 0x24b   : > { %v570_v15 = vrot.slane %v569_v14, 4 }
 0x24d   : > { %v571_v17 = vadd.f32 %v570_v15, %v569_v14 }
 0x24f   : > { %v572_v18 = vrot.slane %v571_v17, 2 }
 0x251   : > { %v573_v19 = vadd.f32 %v572_v18, %v571_v17 }
 0x253   : > { %v574_v20 = vrot.slane %v573_v19, 1 }
 0x255   : > { %v575_v22 = vadd.f32 %v574_v20, %v573_v19 }
 0x257   : > { %774 = vpush %v575_v22 }
 0x288   : > { %s775_s9 = spop %774 }
 0x289   : > { %v577_v16 = vstv %s775_s9 }
 0x28a   : > { %579 = vst.msk [vmem:[%s295_s8] sm:$0x1] %vm578_vm4, %v577_v16 }
 0x2b6   : > { %v541_v27 = vpop.xlane.xlu1 %540 }
 0x2b7   : > { %v553_v28 = vadd.f32 %v552_v26, %v541_v27 }
 0x2b8   : > { %v550_v30 = vpop.xlane.xlu0 %549 }
 0x2b9   : > { %555 = vst.msk [vmem:[#allocation5] sm:$0xff] %vm318_vm0, %v553_v28  ;;  %v558_v31 = vmul.f32 %v550_v30, %v1011_v21 }
 0x2bb   : > { %v559_v33 = vsub.f32 %v541_v27, %v558_v31 }
 0x2bd   : > { %v560_v34 = vadd.f32 %v559_v33, %v557_v32 }
 0x2bf   : > { %561 = vst.msk [vmem:[#allocation6] sm:$0xff] %vm318_vm0, %v560_v34 }
 0x2c0   : > { %v582_v35 = vld [vmem:[#allocation5] sm:$0xff] }
 0x2c1   : > { %583 = vst.msk [vmem:[%s303_s11] sm:$0xff] %vm318_vm0, %v582_v35 }
 0x2c6   : > { %v584_v36 = vld [vmem:[#allocation6] sm:$0xff] }
 0x2c7   : > { %585 = vst.msk [vmem:[%s307_s14] sm:$0xff] %vm318_vm0, %v584_v36 }
 0x2c8 PF: > { %s18_s23 = sadd.s32 1, %s886_s23   ;;  %s1077_s21 = smov %s882_s22 }
 0x2c9   : > { %p15_p3 = scmp.ge.s32.totalorder %s18_s23, 4   ;;  %s1078_s22 = smov %s1080_s25 }
 0x2cb   :  { %17 = sbr.rel (!%p15_p3) target bundleno = 2 (0x2), region = 111 }
 0x2d2   :  { %645 = vsyncpa [#allocation9], 1 }
 0x2d3   :  { %647 = vsyncpa [#allocation9 + $0x1], 1 }

</bundles_post_ra>
